<compile_context>
chip_gen: v5e
topology: v5e:2x2
jax: 0.10.0
libtpu: 0.0.40
codegen_flags: <defaults>
</compile_context>

<pallas_src>
import functools
from typing import NamedTuple

import jax
import jax.numpy as jnp
from jax import lax
from jax.experimental import pallas as pl
from jax.experimental.pallas import tpu as pltpu

_LANE = 128
_CONTRACT_LAST = (((1,), (1,)), ((), ()))   # x @ w^T contracting the last dims


def _round_up(x: int, m: int) -> int:
    return ((x + m - 1) // m) * m


def _cdiv(a: int, b: int) -> int:
    return (a + b - 1) // b


class MHSAConfig(NamedTuple):
    batch: int
    channels: int
    num_heads: int
    head_dim: int
    depth: int
    height: int
    width: int
    total_features: int
    f_tile: int
    n_split: int
    n_per_split: int
    f_padded: int
    vmem_limit_bytes: int


def _vmem_capacity_bytes() -> int:
    """Physical VMEM of the local TPU generation (v5e/v6e: 128 MiB, v7x: 64 MiB)."""
    try:
        info = pltpu.get_tpu_info()
        cap = int(getattr(info, "vmem_capacity_bytes", 0) or 0)
        if cap > 0:
            return cap
    except Exception:
        pass
    return 64 * 1024 * 1024   # conservative fallback = smallest across generations


def _choose_tiling(F: int, C: int, BC: int, max_f_tile=None):
    """VMEM-budget-driven, generation-aware F tiling (review items 1-2)."""
    vmem_cap = _vmem_capacity_bytes()
    # Scoped VMEM limit: ~48 MiB on v7x (64 MiB physical), ~96 MiB on v5e/v6e.
    vmem_limit = min((vmem_cap * 3) // 4, 112 * 1024 * 1024)

    # Kernel A streams per F column (double buffered, bf16):
    #   activations (3, B*C, f_tile) + weights (3, C, f_tile)  -> 12*(BC+C) B/col.
    # Kernel B streams strictly less per column, so Kernel A sets the tile.
    col_bytes = 12 * (BC + C)
    resident = 4 * (3 * BC * C * 4) + (2 << 20)        # accumulator blocks + slack
    budget = max(0, (vmem_limit * 3) // 4 - resident)
    f_tile = max(_LANE, (budget // col_bytes) // _LANE * _LANE)
    if max_f_tile is not None:
        f_tile = max(_LANE, min(f_tile, _round_up(int(max_f_tile), _LANE)))

    # Split the F reduction into two "parallel" chunks so both v7x TensorCores
    # get work even at batch 1; on single-core chips the extra chunk is ~free.
    F_128 = _round_up(F, _LANE)
    n_split = 2 if F_128 >= 2 * _LANE else 1

    F_per = _cdiv(F, n_split)
    f_tile = min(f_tile, _round_up(F_per, _LANE))
    n_per = _cdiv(F_per, f_tile)
    f_tile = _round_up(_cdiv(F_per, n_per), _LANE)     # rebalance -> minimal zero pad
    F_pad = n_split * n_per * f_tile
    return f_tile, n_split, n_per, F_pad, int(vmem_limit)


def prepare_mhsa_params(params, *, channels, num_heads, depth, height, width,
                        batch_size, max_f_tile=None):
    """One-time weight preprocessing (hoisted out of the per-forward path)."""
    C = channels
    assert C % num_heads == 0, "channels must be divisible by num_heads"
    F = depth * height * width
    BC = batch_size * C
    f_tile, n_split, n_per, F_pad, vmem_limit = _choose_tiling(F, C, BC, max_f_tile)
    pad = F_pad - F

    wq, bq, wk, bk, wv, bv, wf, bf = params

    wqkv = jnp.stack([wq, wk, wv], axis=0)                         # (3, C, F)
    if pad:
        wqkv = jnp.pad(wqkv, ((0, 0), (0, 0), (0, pad)))
    wqkv = wqkv.astype(jnp.bfloat16)                               # (3, C, F_pad)
    bqkv = jnp.stack([bq, bk, bv], axis=0).reshape(3, 1, C).astype(jnp.float32)

    wf_p = jnp.pad(wf, ((0, pad), (0, 0))) if pad else wf
    wf_p = wf_p.astype(jnp.bfloat16)                               # (F_pad, C)
    bf_p = bf.reshape(1, F).astype(jnp.float32)
    if pad:
        bf_p = jnp.pad(bf_p, ((0, 0), (0, pad)))                   # (1, F_pad)

    cfg = MHSAConfig(batch=batch_size, channels=C, num_heads=num_heads,
                     head_dim=C // num_heads, depth=depth, height=height,
                     width=width, total_features=F, f_tile=f_tile,
                     n_split=n_split, n_per_split=n_per, f_padded=F_pad,
                     vmem_limit_bytes=vmem_limit)
    return cfg, (wqkv, bqkv, wf_p, bf_p)


# --------------------------- Kernel A: QKV projection ------------------------
def _qkv_proj_kernel(x_ref, w_ref, part_ref):
    """Grid = (n_split, n_per_split); axis 1 is the F reduction.

    x_ref:    (3, B*C, f_tile) bf16   stacked q/k/v activations (batch in M)
    w_ref:    (3, C,   f_tile) bf16   stacked wq/wk/wv
    part_ref: (3, B*C, C)      f32    per-split partial projections (resident)
    """
    @pl.when(pl.program_id(1) == 0)
    def _init():
        part_ref[...] = jnp.zeros_like(part_ref)

    for i in range(3):      # unrolled q / k / v partials: bf16 MXU, f32 accumulate
        part_ref[i] += lax.dot_general(x_ref[i], w_ref[i], _CONTRACT_LAST,
                                       preferred_element_type=jnp.float32)


# ----------------------- Kernel A2: per-batch attention ----------------------
def _attention_kernel(part_ref, bqkv_ref, attn_ref, *, n_split, num_heads, head_dim):
    """Grid = (batch,).  Combine split partials + bias, per-head attention.

    part_ref: (n_split*3, 1, C, C) f32 partial projections for this batch elem
    bqkv_ref: (3, 1, C)            f32
    attn_ref: (1, C, C)            bf16 merged-head attention output
    """
    c = num_heads * head_dim
    parts = part_ref[...]
    bias = bqkv_ref[...]

    def proj(i):
        acc = parts[i, 0]
        for s in range(1, n_split):
            acc = acc + parts[s * 3 + i, 0]
        return acc + bias[i]                          # (C, C) + (1, C)

    scale = 1.0 / float(head_dim) ** 0.5
    q_p = proj(0) * scale                             # fold 1/sqrt(d) into Q
    k_p = proj(1)
    v_p = proj(2)

    # bf16 operands for the MXU, f32 accumulation (review item 8).
    qh = q_p.reshape(c, num_heads, head_dim).astype(jnp.bfloat16)
    kh = k_p.reshape(c, num_heads, head_dim).astype(jnp.bfloat16)
    vh = v_p.reshape(c, num_heads, head_dim).astype(jnp.bfloat16)

    # Batched over heads; softmax in f32 with an exact divide (parity).
    s = jnp.einsum("qhd,khd->hqk", qh, kh, preferred_element_type=jnp.float32)
    s = s - jnp.max(s, axis=-1, keepdims=True)
    p = jnp.exp(s)
    p = p / jnp.sum(p, axis=-1, keepdims=True)
    o = jnp.einsum("hqk,khd->qhd", p.astype(jnp.bfloat16), vh,
                   preferred_element_type=jnp.float32)
    # (C, nH, hd) -> (C, C): identical to torch's permute + view head merge.
    # NOTE: for very large C on v7x this per-batch working set could be chunked
    # over heads; not needed at typical channel counts.
    attn_ref[0] = o.reshape(c, c).astype(jnp.bfloat16)


# ------------------------ Kernel B: output projection ------------------------
def _output_proj_kernel(attn_ref, wf_ref, bf_ref, o_ref):
    """Grid = (F tiles,), all parallel.

    attn_ref: (B*C, C)    bf16 (constant block -> fetched once)
    wf_ref:   (f_tile, C) bf16
    bf_ref:   (1, f_tile) f32
    o_ref:    (B*C, f_tile) f32
    """
    o_ref[...] = lax.dot_general(attn_ref[...], wf_ref[...], _CONTRACT_LAST,
                                 preferred_element_type=jnp.float32) + bf_ref[...]


# --------------------------------- Forward -----------------------------------
def multi_head_self_attention(q, k, v, prepped, *, cfg: MHSAConfig):
    """q, k, v: (B, C, D, H, W) float32 -> (B, C, D, H, W) float32."""
    wqkv, bqkv, wf_p, bf_p = prepped
    B, C = cfg.batch, cfg.channels
    F, F_pad, f_tile = cfg.total_features, cfg.f_padded, cfg.f_tile
    n_split, n_per = cfg.n_split, cfg.n_per_split
    BC = B * C
    pad = F_pad - F
    assert q.shape == (B, C, cfg.depth, cfg.height, cfg.width)

    # Per-call activation prep (single fused XLA pass): flatten, stack, zero-pad
    # the contracted F axis, cast to bf16.
    x = jnp.stack([q.reshape(BC, F), k.reshape(BC, F), v.reshape(BC, F)], axis=0)
    if pad:
        x = jnp.pad(x, ((0, 0), (0, 0), (0, pad)))
    x = x.astype(jnp.bfloat16)                                     # (3, BC, F_pad)

    # ---- Kernel A: F-tiled QKV projection reduction (weights streamed once). ----
    partials = pl.pallas_call(
        _qkv_proj_kernel,
        out_shape=jax.ShapeDtypeStruct((n_split * 3, BC, C), jnp.float32),
        grid_spec=pltpu.PrefetchScalarGridSpec(
            num_scalar_prefetch=0,
            grid=(n_split, n_per),
            in_specs=[
                pl.BlockSpec((3, BC, f_tile), lambda s, j: (0, 0, s * n_per + j)),
                pl.BlockSpec((3, C, f_tile), lambda s, j: (0, 0, s * n_per + j)),
            ],
            out_specs=pl.BlockSpec((3, BC, C), lambda s, j: (s, 0, 0)),
        ),
        compiler_params=pltpu.CompilerParams(
            dimension_semantics=("parallel", "arbitrary"),
            vmem_limit_bytes=cfg.vmem_limit_bytes,
        ),
    )(x, wqkv)

    # (n_split*3, B*C, C) -> (n_split*3, B, C, C): contiguous reshape, free.
    partials = partials.reshape(n_split * 3, B, C, C)

    # ---- Kernel A2: combine split partials + bias, per-head attention. ----
    attn = pl.pallas_call(
        functools.partial(_attention_kernel, n_split=n_split,
                          num_heads=cfg.num_heads, head_dim=cfg.head_dim),
        out_shape=jax.ShapeDtypeStruct((B, C, C), jnp.bfloat16),
        grid_spec=pltpu.PrefetchScalarGridSpec(
            num_scalar_prefetch=0,
            grid=(B,),
            in_specs=[
                pl.BlockSpec((n_split * 3, 1, C, C), lambda b: (0, b, 0, 0)),
                pl.BlockSpec((3, 1, C), lambda b: (0, 0, 0)),
            ],
            out_specs=pl.BlockSpec((1, C, C), lambda b: (b, 0, 0)),
        ),
        compiler_params=pltpu.CompilerParams(
            dimension_semantics=("parallel",),
            vmem_limit_bytes=cfg.vmem_limit_bytes,
        ),
    )(partials, bqkv)

    attn2 = attn.reshape(BC, C)                                    # free reshape

    # ---- Kernel B: lane-dense output projection over parallel F tiles. ----
    n_out_tiles = F_pad // f_tile
    out_pad = pl.pallas_call(
        _output_proj_kernel,
        out_shape=jax.ShapeDtypeStruct((BC, F_pad), jnp.float32),
        grid_spec=pltpu.PrefetchScalarGridSpec(
            num_scalar_prefetch=0,
            grid=(n_out_tiles,),
            in_specs=[
                pl.BlockSpec((BC, C), lambda j: (0, 0)),
                pl.BlockSpec((f_tile, C), lambda j: (j, 0)),
                pl.BlockSpec((1, f_tile), lambda j: (0, j)),
            ],
            out_specs=pl.BlockSpec((BC, f_tile), lambda j: (0, j)),
        ),
        compiler_params=pltpu.CompilerParams(
            dimension_semantics=("parallel",),
            vmem_limit_bytes=cfg.vmem_limit_bytes,
        ),
    )(attn2, wf_p, bf_p)

    out = out_pad[:, :F] if pad else out_pad
    return out.reshape(B, C, cfg.depth, cfg.height, cfg.width)


# --------------------------- Plain-JAX reference ------------------------------
def _reference(q, k, v, params, *, num_heads):
    B, C, D, H, W = q.shape
    F = D * H * W
    hd = C // num_heads
    wq, bq, wk, bk, wv, bv, wf, bf = params

    def lin(x, w, b):
        return x @ w.T + b

    def split(x):
        return x.reshape(B, C, num_heads, hd).transpose(0, 2, 1, 3)

    Q = split(lin(q.reshape(B, C, F), wq, bq))
    K = split(lin(k.reshape(B, C, F), wk, bk))
    V = split(lin(v.reshape(B, C, F), wv, bv))
    logits = jnp.einsum("bhqd,bhkd->bhqk", Q, K) / jnp.sqrt(jnp.float32(hd))
    a = jax.nn.softmax(logits, axis=-1)
    out = jnp.einsum("bhqk,bhkd->bhqd", a, V).transpose(0, 2, 1, 3).reshape(B, C, C)
    out = lin(out, wf, bf)
    return out.reshape(B, C, D, H, W)


# ----------------------------------- Main -------------------------------------
if __name__ == "__main__":
    def _make_params(key, channels, F, proj_scale, fc_scale):
        ks = jax.random.split(key, 8)
        wq = proj_scale * jax.random.normal(ks[0], (channels, F), jnp.float32)
        bq = 0.1 * jax.random.normal(ks[1], (channels,), jnp.float32)
        wk = proj_scale * jax.random.normal(ks[2], (channels, F), jnp.float32)
        bk = 0.1 * jax.random.normal(ks[3], (channels,), jnp.float32)
        wv = proj_scale * jax.random.normal(ks[4], (channels, F), jnp.float32)
        bv = 0.1 * jax.random.normal(ks[5], (channels,), jnp.float32)
        wf = fc_scale * jax.random.normal(ks[6], (F, channels), jnp.float32)
        bf = 0.1 * jax.random.normal(ks[7], (F,), jnp.float32)
        return (wq, bq, wk, bk, wv, bv, wf, bf)

    def _run_case(seed, B, channels, num_heads, depth, height, width,
                  proj_scale, fc_scale, max_f_tile, tol):
        F = depth * height * width
        key = jax.random.PRNGKey(seed)
        kq, kk, kv, kp = jax.random.split(key, 4)
        q = jax.random.normal(kq, (B, channels, depth, height, width), jnp.float32)
        k = jax.random.normal(kk, (B, channels, depth, height, width), jnp.float32)
        v = jax.random.normal(kv, (B, channels, depth, height, width), jnp.float32)
        params = _make_params(kp, channels, F, proj_scale, fc_scale)

        # Weight preprocessing happens once, outside the jitted forward.
        cfg, prepped = prepare_mhsa_params(
            params, channels=channels, num_heads=num_heads, depth=depth,
            height=height, width=width, batch_size=B, max_f_tile=max_f_tile)
        fwd = jax.jit(functools.partial(multi_head_self_attention, cfg=cfg))

        out = jax.block_until_ready(fwd(q, k, v, prepped))
        ref = _reference(q, k, v, params, num_heads=num_heads)
        assert out.shape == (B, channels, depth, height, width)
        max_err = float(jnp.max(jnp.abs(out - ref)))
        # bf16 matmul inputs (f32 accumulation) vs pure-f32 reference.
        assert max_err <= tol, f"mismatch vs reference (max abs err {max_err} > {tol})"

    # Case 1: small shapes consistent with the module (single F tile path).
    _run_case(0, B=2, channels=8, num_heads=2, depth=2, height=4, width=4,
              proj_scale=0.1, fc_scale=0.1, max_f_tile=None, tol=2e-2)

    # Case 2: larger spatial volume with a forced small tile, exercising the
    # split F-reduction (2 parallel chunks for v7x megacore), multi-tile
    # accumulation and zero padding of the contracted axis.
    F2 = 5 * 8 * 13
    _run_case(1, B=3, channels=16, num_heads=4, depth=5, height=8, width=13,
              proj_scale=0.5 / F2 ** 0.5, fc_scale=0.5 / 16 ** 0.5,
              max_f_tile=128, tol=3e-2)

    print("KERNEL_OK")
</pallas_src>

<mosaic_0001>
module attributes {stable_mosaic.version = 11 : i64} {
  func.func @_qkv_proj_kernel(%arg0: i32, %arg1: i32, %arg2: memref<3x16x128xbf16, #tpu.memory_space<vmem>>, %arg3: memref<3x8x128xbf16, #tpu.memory_space<vmem>>, %arg4: memref<3x16x8xf32, #tpu.memory_space<vmem>>) attributes {dimension_semantics = [#tpu.dimension_semantics<parallel>, #tpu.dimension_semantics<arbitrary>], iteration_bounds = array<i64: 1, 1>, scalar_prefetch = 0 : i64, scratch_operands = 0 : i64, tpu.core_type = #tpu.core_type<tc>, window_params = [{transform_indices = @transform_0, window_bounds = array<i64: 3, 16, 128>}, {transform_indices = @transform_1, window_bounds = array<i64: 3, 8, 128>}, {transform_indices = @transform_2, window_bounds = array<i64: 3, 16, 8>}]} {
    %c0_i32 = arith.constant 0 : i32
    %0 = arith.cmpi eq, %arg1, %c0_i32 : i32
    %1 = arith.extui %0 : i1 to i32
    %c0_i32_0 = arith.constant 0 : i32
    %2 = arith.cmpi ne, %1, %c0_i32_0 : i32
    scf.if %2 {
      %cst_36 = arith.constant 0.000000e+00 : f32
      %36 = vector.broadcast %cst_36 : f32 to vector<3x16x8xf32>
      %c0_37 = arith.constant 0 : index
      %c0_38 = arith.constant 0 : index
      %c0_39 = arith.constant 0 : index
      %37 = vector.load %arg4[%c0_37, %c0_38, %c0_39] : memref<3x16x8xf32, #tpu.memory_space<vmem>>, vector<3x16x8xf32>
      tpu.vector_store %arg4[%c0_37, %c0_38, %c0_39], %36 {strides = array<i32>} : memref<3x16x8xf32, #tpu.memory_space<vmem>>, vector<3x16x8xf32>,
    } else {
    }
    %c0 = arith.constant 0 : index
    %c0_1 = arith.constant 0 : index
    %c0_2 = arith.constant 0 : index
    %3 = vector.load %arg4[%c0, %c0_1, %c0_2] : memref<3x16x8xf32, #tpu.memory_space<vmem>>, vector<1x16x8xf32>
    %4 = vector.shape_cast %3 : vector<1x16x8xf32> to vector<16x8xf32>
    %c0_3 = arith.constant 0 : index
    %c0_4 = arith.constant 0 : index
    %c0_5 = arith.constant 0 : index
    %5 = vector.load %arg2[%c0_3, %c0_4, %c0_5] : memref<3x16x128xbf16, #tpu.memory_space<vmem>>, vector<1x16x128xbf16>
    %6 = vector.shape_cast %5 : vector<1x16x128xbf16> to vector<16x128xbf16>
    %c0_6 = arith.constant 0 : index
    %c0_7 = arith.constant 0 : index
    %c0_8 = arith.constant 0 : index
    %7 = vector.load %arg3[%c0_6, %c0_7, %c0_8] : memref<3x8x128xbf16, #tpu.memory_space<vmem>>, vector<1x8x128xbf16>
    %8 = vector.shape_cast %7 : vector<1x8x128xbf16> to vector<8x128xbf16>
    %cst = arith.constant dense<0.000000e+00> : vector<16x8xf32>
    %9 = tpu.matmul %6, %8, %cst {dimension_numbers = #tpu.dot_dimension_numbers<[1], [1], [0], [0], [0, 0, 1, 0], [], []>} : vector<16x128xbf16>, vector<8x128xbf16>, vector<16x8xf32> -> vector<16x8xf32>
    %10 = arith.addf %4, %9 : vector<16x8xf32>
    %c0_9 = arith.constant 0 : index
    %c0_10 = arith.constant 0 : index
    %c0_11 = arith.constant 0 : index
    %11 = vector.load %arg4[%c0_9, %c0_10, %c0_11] : memref<3x16x8xf32, #tpu.memory_space<vmem>>, vector<1x16x8xf32>
    %12 = vector.shape_cast %11 : vector<1x16x8xf32> to vector<16x8xf32>
    %13 = vector.shape_cast %10 : vector<16x8xf32> to vector<1x16x8xf32>
    tpu.vector_store %arg4[%c0_9, %c0_10, %c0_11], %13 {strides = array<i32>} : memref<3x16x8xf32, #tpu.memory_space<vmem>>, vector<1x16x8xf32>,
    %c1 = arith.constant 1 : index
    %c0_12 = arith.constant 0 : index
    %c0_13 = arith.constant 0 : index
    %14 = vector.load %arg4[%c1, %c0_12, %c0_13] : memref<3x16x8xf32, #tpu.memory_space<vmem>>, vector<1x16x8xf32>
    %15 = vector.shape_cast %14 : vector<1x16x8xf32> to vector<16x8xf32>
    %c1_14 = arith.constant 1 : index
    %c0_15 = arith.constant 0 : index
    %c0_16 = arith.constant 0 : index
    %16 = vector.load %arg2[%c1_14, %c0_15, %c0_16] : memref<3x16x128xbf16, #tpu.memory_space<vmem>>, vector<1x16x128xbf16>
    %17 = vector.shape_cast %16 : vector<1x16x128xbf16> to vector<16x128xbf16>
    %c1_17 = arith.constant 1 : index
    %c0_18 = arith.constant 0 : index
    %c0_19 = arith.constant 0 : index
    %18 = vector.load %arg3[%c1_17, %c0_18, %c0_19] : memref<3x8x128xbf16, #tpu.memory_space<vmem>>, vector<1x8x128xbf16>
    %19 = vector.shape_cast %18 : vector<1x8x128xbf16> to vector<8x128xbf16>
    %cst_20 = arith.constant dense<0.000000e+00> : vector<16x8xf32>
    %20 = tpu.matmul %17, %19, %cst_20 {dimension_numbers = #tpu.dot_dimension_numbers<[1], [1], [0], [0], [0, 0, 1, 0], [], []>} : vector<16x128xbf16>, vector<8x128xbf16>, vector<16x8xf32> -> vector<16x8xf32>
    %21 = arith.addf %15, %20 : vector<16x8xf32>
    %c1_21 = arith.constant 1 : index
    %c0_22 = arith.constant 0 : index
    %c0_23 = arith.constant 0 : index
    %22 = vector.load %arg4[%c1_21, %c0_22, %c0_23] : memref<3x16x8xf32, #tpu.memory_space<vmem>>, vector<1x16x8xf32>
    %23 = vector.shape_cast %22 : vector<1x16x8xf32> to vector<16x8xf32>
    %24 = vector.shape_cast %21 : vector<16x8xf32> to vector<1x16x8xf32>
    tpu.vector_store %arg4[%c1_21, %c0_22, %c0_23], %24 {strides = array<i32>} : memref<3x16x8xf32, #tpu.memory_space<vmem>>, vector<1x16x8xf32>,
    %c2 = arith.constant 2 : index
    %c0_24 = arith.constant 0 : index
    %c0_25 = arith.constant 0 : index
    %25 = vector.load %arg4[%c2, %c0_24, %c0_25] : memref<3x16x8xf32, #tpu.memory_space<vmem>>, vector<1x16x8xf32>
    %26 = vector.shape_cast %25 : vector<1x16x8xf32> to vector<16x8xf32>
    %c2_26 = arith.constant 2 : index
    %c0_27 = arith.constant 0 : index
    %c0_28 = arith.constant 0 : index
    %27 = vector.load %arg2[%c2_26, %c0_27, %c0_28] : memref<3x16x128xbf16, #tpu.memory_space<vmem>>, vector<1x16x128xbf16>
    %28 = vector.shape_cast %27 : vector<1x16x128xbf16> to vector<16x128xbf16>
    %c2_29 = arith.constant 2 : index
    %c0_30 = arith.constant 0 : index
    %c0_31 = arith.constant 0 : index
    %29 = vector.load %arg3[%c2_29, %c0_30, %c0_31] : memref<3x8x128xbf16, #tpu.memory_space<vmem>>, vector<1x8x128xbf16>
    %30 = vector.shape_cast %29 : vector<1x8x128xbf16> to vector<8x128xbf16>
    %cst_32 = arith.constant dense<0.000000e+00> : vector<16x8xf32>
    %31 = tpu.matmul %28, %30, %cst_32 {dimension_numbers = #tpu.dot_dimension_numbers<[1], [1], [0], [0], [0, 0, 1, 0], [], []>} : vector<16x128xbf16>, vector<8x128xbf16>, vector<16x8xf32> -> vector<16x8xf32>
    %32 = arith.addf %26, %31 : vector<16x8xf32>
    %c2_33 = arith.constant 2 : index
    %c0_34 = arith.constant 0 : index
    %c0_35 = arith.constant 0 : index
    %33 = vector.load %arg4[%c2_33, %c0_34, %c0_35] : memref<3x16x8xf32, #tpu.memory_space<vmem>>, vector<1x16x8xf32>
    %34 = vector.shape_cast %33 : vector<1x16x8xf32> to vector<16x8xf32>
    %35 = vector.shape_cast %32 : vector<16x8xf32> to vector<1x16x8xf32>
    tpu.vector_store %arg4[%c2_33, %c0_34, %c0_35], %35 {strides = array<i32>} : memref<3x16x8xf32, #tpu.memory_space<vmem>>, vector<1x16x8xf32>,
    return
  }
  func.func @transform_0(%arg0: i32, %arg1: i32) -> (i32, i32, i32) {
    %c1_i32 = arith.constant 1 : i32
    %0 = arith.muli %arg0, %c1_i32 : i32
    %1 = arith.addi %0, %arg1 : i32
    %c0_i32 = arith.constant 0 : i32
    %c0_i32_0 = arith.constant 0 : i32
    %c0_i32_1 = arith.constant 0 : i32
    return %c0_i32, %c0_i32_0, %1 : i32, i32, i32
  }
  func.func @transform_1(%arg0: i32, %arg1: i32) -> (i32, i32, i32) {
    %c1_i32 = arith.constant 1 : i32
    %0 = arith.muli %arg0, %c1_i32 : i32
    %1 = arith.addi %0, %arg1 : i32
    %c0_i32 = arith.constant 0 : i32
    %c0_i32_0 = arith.constant 0 : i32
    %c0_i32_1 = arith.constant 0 : i32
    return %c0_i32, %c0_i32_0, %1 : i32, i32, i32
  }
  func.func @transform_2(%arg0: i32, %arg1: i32) -> (i32, i32, i32) {
    %c0_i32 = arith.constant 0 : i32
    %c0_i32_0 = arith.constant 0 : i32
    %c0_i32_1 = arith.constant 0 : i32
    return %arg0, %c0_i32, %c0_i32_0 : i32, i32, i32
  }
}

module attributes {stable_mosaic.version = 11 : i64} {
  func.func @_output_proj_kernel(%arg0: i32, %arg1: memref<16x8xbf16, #tpu.memory_space<vmem>>, %arg2: memref<128x8xbf16, #tpu.memory_space<vmem>>, %arg3: memref<1x128xf32, #tpu.memory_space<vmem>>, %arg4: memref<16x128xf32, #tpu.memory_space<vmem>>) attributes {dimension_semantics = [#tpu.dimension_semantics<parallel>], iteration_bounds = array<i64: 1>, scalar_prefetch = 0 : i64, scratch_operands = 0 : i64, tpu.core_type = #tpu.core_type<tc>, window_params = [{pipeline_mode = #tpu.pipeline_mode<synchronous>, transform_indices = @transform_0, window_bounds = array<i64: 16, 8>}, {transform_indices = @transform_1, window_bounds = array<i64: 128, 8>}, {transform_indices = @transform_2, window_bounds = array<i64: 1, 128>}, {transform_indices = @transform_3, window_bounds = array<i64: 16, 128>}]} {
    %c0 = arith.constant 0 : index
    %c0_0 = arith.constant 0 : index
    %0 = vector.load %arg1[%c0, %c0_0] : memref<16x8xbf16, #tpu.memory_space<vmem>>, vector<16x8xbf16>
    %c0_1 = arith.constant 0 : index
    %c0_2 = arith.constant 0 : index
    %1 = vector.load %arg2[%c0_1, %c0_2] : memref<128x8xbf16, #tpu.memory_space<vmem>>, vector<128x8xbf16>
    %cst = arith.constant dense<0.000000e+00> : vector<16x128xf32>
    %2 = tpu.matmul %0, %1, %cst {dimension_numbers = #tpu.dot_dimension_numbers<[1], [1], [0], [0], [0, 0, 1, 0], [], []>} : vector<16x8xbf16>, vector<128x8xbf16>, vector<16x128xf32> -> vector<16x128xf32>
    %c0_3 = arith.constant 0 : index
    %c0_4 = arith.constant 0 : index
    %3 = vector.load %arg3[%c0_3, %c0_4] : memref<1x128xf32, #tpu.memory_space<vmem>>, vector<1x128xf32>
    %4 = vector.broadcast %3 : vector<1x128xf32> to vector<16x128xf32>
    %5 = arith.addf %2, %4 : vector<16x128xf32>
    %c0_5 = arith.constant 0 : index
    %c0_6 = arith.constant 0 : index
    %6 = vector.load %arg4[%c0_5, %c0_6] : memref<16x128xf32, #tpu.memory_space<vmem>>, vector<16x128xf32>
    tpu.vector_store %arg4[%c0_5, %c0_6], %5 {strides = array<i32>} : memref<16x128xf32, #tpu.memory_space<vmem>>, vector<16x128xf32>,
    return
  }
  func.func @transform_0(%arg0: i32) -> (i32, i32) {
    %c0_i32 = arith.constant 0 : i32
    %c0_i32_0 = arith.constant 0 : i32
    %c0_i32_1 = arith.constant 0 : i32
    return %c0_i32, %c0_i32_0 : i32, i32
  }
  func.func @transform_1(%arg0: i32) -> (i32, i32) {
    %c0_i32 = arith.constant 0 : i32
    %c0_i32_0 = arith.constant 0 : i32
    return %arg0, %c0_i32 : i32, i32
  }
  func.func @transform_2(%arg0: i32) -> (i32, i32) {
    %c0_i32 = arith.constant 0 : i32
    %c0_i32_0 = arith.constant 0 : i32
    return %c0_i32, %arg0 : i32, i32
  }
  func.func @transform_3(%arg0: i32) -> (i32, i32) {
    %c0_i32 = arith.constant 0 : i32
    %c0_i32_0 = arith.constant 0 : i32
    return %c0_i32, %arg0 : i32, i32
  }
}

module attributes {stable_mosaic.version = 11 : i64} {
  func.func @_attention_kernel(%arg0: i32, %arg1: memref<3x1x8x8xf32, #tpu.memory_space<vmem>>, %arg2: memref<3x1x8xf32, #tpu.memory_space<vmem>>, %arg3: memref<1x8x8xbf16, #tpu.memory_space<vmem>>) attributes {dimension_semantics = [#tpu.dimension_semantics<parallel>], iteration_bounds = array<i64: 2>, scalar_prefetch = 0 : i64, scratch_operands = 0 : i64, tpu.core_type = #tpu.core_type<tc>, window_params = [{transform_indices = @transform_0, window_bounds = array<i64: 3, 1, 8, 8>}, {pipeline_mode = #tpu.pipeline_mode<synchronous>, transform_indices = @transform_1, window_bounds = array<i64: 3, 1, 8>}, {transform_indices = @transform_2, window_bounds = array<i64: 1, 8, 8>}]} {
    %c0 = arith.constant 0 : index
    %c0_0 = arith.constant 0 : index
    %c0_1 = arith.constant 0 : index
    %c0_2 = arith.constant 0 : index
    %0 = vector.load %arg1[%c0, %c0_0, %c0_1, %c0_2] : memref<3x1x8x8xf32, #tpu.memory_space<vmem>>, vector<3x1x8x8xf32>
    %c0_3 = arith.constant 0 : index
    %c0_4 = arith.constant 0 : index
    %c0_5 = arith.constant 0 : index
    %1 = vector.load %arg2[%c0_3, %c0_4, %c0_5] : memref<3x1x8xf32, #tpu.memory_space<vmem>>, vector<3x1x8xf32>
    %2 = vector.extract_strided_slice %0 {offsets = [0, 0, 0, 0], sizes = [1, 1, 8, 8], strides = [1, 1, 1, 1]} : vector<3x1x8x8xf32> to vector<1x1x8x8xf32>
    %3 = vector.shape_cast %2 : vector<1x1x8x8xf32> to vector<8x8xf32>
    %4 = vector.extract_strided_slice %1 {offsets = [0, 0, 0], sizes = [1, 1, 8], strides = [1, 1, 1]} : vector<3x1x8xf32> to vector<1x1x8xf32>
    %5 = vector.shape_cast %4 : vector<1x1x8xf32> to vector<1x8xf32>
    %6 = vector.broadcast %5 : vector<1x8xf32> to vector<8x8xf32>
    %7 = arith.addf %3, %6 : vector<8x8xf32>
    %cst = arith.constant 5.000000e-01 : f32
    %8 = vector.broadcast %cst : f32 to vector<8x8xf32>
    %9 = arith.mulf %7, %8 : vector<8x8xf32>
    %10 = vector.extract_strided_slice %0 {offsets = [1, 0, 0, 0], sizes = [1, 1, 8, 8], strides = [1, 1, 1, 1]} : vector<3x1x8x8xf32> to vector<1x1x8x8xf32>
    %11 = vector.shape_cast %10 : vector<1x1x8x8xf32> to vector<8x8xf32>
    %12 = vector.extract_strided_slice %1 {offsets = [1, 0, 0], sizes = [1, 1, 8], strides = [1, 1, 1]} : vector<3x1x8xf32> to vector<1x1x8xf32>
    %13 = vector.shape_cast %12 : vector<1x1x8xf32> to vector<1x8xf32>
    %14 = vector.broadcast %13 : vector<1x8xf32> to vector<8x8xf32>
    %15 = arith.addf %11, %14 : vector<8x8xf32>
    %16 = vector.extract_strided_slice %0 {offsets = [2, 0, 0, 0], sizes = [1, 1, 8, 8], strides = [1, 1, 1, 1]} : vector<3x1x8x8xf32> to vector<1x1x8x8xf32>
    %17 = vector.shape_cast %16 : vector<1x1x8x8xf32> to vector<8x8xf32>
    %18 = vector.extract_strided_slice %1 {offsets = [2, 0, 0], sizes = [1, 1, 8], strides = [1, 1, 1]} : vector<3x1x8xf32> to vector<1x1x8xf32>
    %19 = vector.shape_cast %18 : vector<1x1x8xf32> to vector<1x8xf32>
    %20 = vector.broadcast %19 : vector<1x8xf32> to vector<8x8xf32>
    %21 = arith.addf %17, %20 : vector<8x8xf32>
    %22 = vector.shape_cast %9 : vector<8x8xf32> to vector<8x2x4xf32>
    %23 = arith.truncf %22 : vector<8x2x4xf32> to vector<8x2x4xbf16>
    %24 = vector.shape_cast %15 : vector<8x8xf32> to vector<8x2x4xf32>
    %25 = arith.truncf %24 : vector<8x2x4xf32> to vector<8x2x4xbf16>
    %26 = vector.shape_cast %21 : vector<8x8xf32> to vector<8x2x4xf32>
    %27 = arith.truncf %26 : vector<8x2x4xf32> to vector<8x2x4xbf16>
    "tpu.trace_start"() <{level = 10 : i32, message = "qhd,khd->hqk"}> : () -> ()
    %cst_6 = arith.constant dense<0.000000e+00> : vector<2x8x8xf32>
    %28 = tpu.matmul %23, %25, %cst_6 {dimension_numbers = #tpu.dot_dimension_numbers<[2], [2], [0], [0], [0, 1, 0, 0, 1, 0], [1], [1]>} : vector<8x2x4xbf16>, vector<8x2x4xbf16>, vector<2x8x8xf32> -> vector<2x8x8xf32>
    "tpu.trace_stop"() : () -> ()
    %cst_7 = arith.constant dense<0xFF800000> : vector<2x8xf32>
    %29 = vector.multi_reduction <maximumf>, %28, %cst_7 [2] : vector<2x8x8xf32> to vector<2x8xf32>
    %30 = vector.shape_cast %29 : vector<2x8xf32> to vector<2x8x1xf32>
    %31 = vector.broadcast %30 : vector<2x8x1xf32> to vector<2x8x8xf32>
    %32 = arith.subf %28, %31 : vector<2x8x8xf32>
    %33 = math.exp %32 : vector<2x8x8xf32>
    %cst_8 = arith.constant dense<0.000000e+00> : vector<2x8xf32>
    %34 = vector.multi_reduction <add>, %33, %cst_8 [2] : vector<2x8x8xf32> to vector<2x8xf32>
    %35 = vector.shape_cast %34 : vector<2x8xf32> to vector<2x8x1xf32>
    %36 = vector.broadcast %35 : vector<2x8x1xf32> to vector<2x8x8xf32>
    %37 = arith.divf %33, %36 : vector<2x8x8xf32>
    %38 = arith.truncf %37 : vector<2x8x8xf32> to vector<2x8x8xbf16>
    "tpu.trace_start"() <{level = 10 : i32, message = "hqk,khd->qhd"}> : () -> ()
    %cst_9 = arith.constant dense<0.000000e+00> : vector<2x4x8xf32>
    %39 = tpu.matmul %27, %38, %cst_9 {dimension_numbers = #tpu.dot_dimension_numbers<[0], [2], [2], [1], [0, 1, 0, 2, 1, 1], [1], [0]>} : vector<8x2x4xbf16>, vector<2x8x8xbf16>, vector<2x4x8xf32> -> vector<2x4x8xf32>
    %40 = tpu.transpose %39, [2, 0, 1] : vector<2x4x8xf32> -> vector<8x2x4xf32>
    "tpu.trace_stop"() : () -> ()
    %41 = vector.shape_cast %40 : vector<8x2x4xf32> to vector<8x8xf32>
    %42 = arith.truncf %41 : vector<8x8xf32> to vector<8x8xbf16>
    %c0_10 = arith.constant 0 : index
    %c0_11 = arith.constant 0 : index
    %c0_12 = arith.constant 0 : index
    %43 = vector.load %arg3[%c0_10, %c0_11, %c0_12] : memref<1x8x8xbf16, #tpu.memory_space<vmem>>, vector<1x8x8xbf16>
    %44 = vector.shape_cast %43 : vector<1x8x8xbf16> to vector<8x8xbf16>
    %45 = vector.shape_cast %42 : vector<8x8xbf16> to vector<1x8x8xbf16>
    tpu.vector_store %arg3[%c0_10, %c0_11, %c0_12], %45 {strides = array<i32>} : memref<1x8x8xbf16, #tpu.memory_space<vmem>>, vector<1x8x8xbf16>,
    return
  }
  func.func @transform_0(%arg0: i32) -> (i32, i32, i32, i32) {
    %c0_i32 = arith.constant 0 : i32
    %c0_i32_0 = arith.constant 0 : i32
    %c0_i32_1 = arith.constant 0 : i32
    %c0_i32_2 = arith.constant 0 : i32
    return %c0_i32, %arg0, %c0_i32_0, %c0_i32_1 : i32, i32, i32, i32
  }
  func.func @transform_1(%arg0: i32) -> (i32, i32, i32) {
    %c0_i32 = arith.constant 0 : i32
    %c0_i32_0 = arith.constant 0 : i32
    %c0_i32_1 = arith.constant 0 : i32
    %c0_i32_2 = arith.constant 0 : i32
    return %c0_i32, %c0_i32_0, %c0_i32_1 : i32, i32, i32
  }
  func.func @transform_2(%arg0: i32) -> (i32, i32, i32) {
    %c0_i32 = arith.constant 0 : i32
    %c0_i32_0 = arith.constant 0 : i32
    %c0_i32_1 = arith.constant 0 : i32
    return %arg0, %c0_i32, %c0_i32_0 : i32, i32, i32
  }
}

</mosaic_0001>

<bundles_post_ra>
// kernel: multi_head_self_attention.3
= control target key start
LH: loop header
LB: loop body
LE: loop exit
PB: predicated region body
PF: predicated region fallthrough
CT: control target
= control target key end

     0   :  { %vm50_vm0 = vcmask 64512   ;;  %v197_v3 = vmov 0.0   ;;  %s297_s1 = inlined_call_operand.vmem [shape: bf16[3,8,128], index: 1, kind: input, shape index: {}]   ;;  %s298_s2 = inlined_call_operand.vmem [shape: f32[3,16,8], index: 2, kind: output, shape index: {}]   ;;  %s299_s0 = inlined_call_operand.vmem [shape: bf16[3,16,128], index: 0, kind: input, shape index: {}]  }
   0x1   :  { %v61_v0 = vld [vmem:[%s297_s1] sm:$0xf]  ;;  %v175_v1 = vld [vmem:[%s297_s1 + $0x4] sm:$0xf]  ;;  %v186_v2 = vld [vmem:[%s297_s1 + $0x8] sm:$0xf] }
   0x2   :  { %75 = vmatpush.bf16.xpose.msra.mxu0 %v61_v0  ;;  %108 = vmatpush.bf16.xpose.msra.mxu1 %v175_v1  ;;  %51 = vst.msk [vmem:[%s298_s2] sm:$0xff] %vm50_vm0, %v197_v3  ;;  %v193_v4 = vld [vmem:[%s299_s0] sm:$0xff]  ;;  %v194_v5 = vld [vmem:[%s299_s0 + $0x8] sm:$0xff]  ;;  %v195_v6 = vld [vmem:[%s299_s0 + $0x10] sm:$0xff] }
   0x3   :  { %140 = vmatpush.bf16.xpose.msra.mxu2 %v186_v2  ;;  %52 = vst.msk [vmem:[%s298_s2 + $0x8] sm:$0xff] %vm50_vm0, %v197_v3 }
   0x4   :  { %53 = vst.msk [vmem:[%s298_s2 + $0x10] sm:$0xff] %vm50_vm0, %v197_v3 }
   0x5   :  { %54 = vst.msk [vmem:[%s298_s2 + $0x18] sm:$0xff] %vm50_vm0, %v197_v3 }
   0x6   :  { %55 = vst.msk [vmem:[%s298_s2 + $0x20] sm:$0xff] %vm50_vm0, %v197_v3 }
   0x7   :  { %56 = vst.msk [vmem:[%s298_s2 + $0x28] sm:$0xff] %vm50_vm0, %v197_v3 }
   0x9   :  { %76 = vmatmul.bf16.vlgmr.msra.gmra.mxu0 %v193_v4  ;;  %109 = vmatmul.bf16.vlgmr.msra.gmra.mxu1 %v194_v5  ;;  %v57_v7 = vld [vmem:[%s298_s2] sm:$0xff] }
   0xa   :  { %141 = vmatmul.bf16.vlgmr.msra.gmra.mxu2 %v195_v6  ;;  %v58_v14 = vld [vmem:[%s298_s2 + $0x8] sm:$0xff] }
   0xb   :  { %v171_v8 = vld [vmem:[%s298_s2 + $0x10] sm:$0xff] }
   0xc   :  { %v172_v15 = vld [vmem:[%s298_s2 + $0x18] sm:$0xff] }
   0xd   :  { %v182_v13 = vld [vmem:[%s298_s2 + $0x20] sm:$0xff] }
   0xe   :  { %v183_v22 = vld [vmem:[%s298_s2 + $0x28] sm:$0xff] }
  0x86   :  { %v77_v9 = vpop.f32.mrf.mxu0  ;;  %v110_v10 = vpop.f32.mrf.mxu1 }
  0x87   :  { %v82_v11 = vadd.f32 %v77_v9, %v57_v7  ;;  %v115_v12 = vadd.f32 %v171_v8, %v110_v10 }
  0x89   :  { %85 = vst.msk [vmem:[%s298_s2] sm:$0xff] %vm50_vm0, %v82_v11 }
  0x8a   :  { %180 = vst.msk [vmem:[%s298_s2 + $0x10] sm:$0xff] %vm50_vm0, %v115_v12 }
  0x8d   :  { %v142_v16 = vpop.f32.mrf.mxu2 }
  0x8e   :  { %v147_v17 = vadd.f32 %v182_v13, %v142_v16  ;;  %v79_v18 = vpop.f32.mrf.mxu0  ;;  %v112_v19 = vpop.f32.mrf.mxu1 }
  0x8f   :  { %v83_v20 = vadd.f32 %v79_v18, %v58_v14  ;;  %v116_v21 = vadd.f32 %v172_v15, %v112_v19 }
  0x90   :  { %191 = vst.msk [vmem:[%s298_s2 + $0x20] sm:$0xff] %vm50_vm0, %v147_v17 }
  0x91   :  { %86 = vst.msk [vmem:[%s298_s2 + $0x8] sm:$0xff] %vm50_vm0, %v83_v20 }
  0x92   :  { %181 = vst.msk [vmem:[%s298_s2 + $0x18] sm:$0xff] %vm50_vm0, %v116_v21 }
  0x95   :  { %v144_v23 = vpop.f32.mrf.mxu2 }
  0x96   :  { %v148_v24 = vadd.f32 %v183_v22, %v144_v23 }
  0x98   :  { %192 = vst.msk [vmem:[%s298_s2 + $0x28] sm:$0xff] %vm50_vm0, %v148_v24 }

// kernel: multi_head_self_attention.5
= control target key start
LH: loop header
LB: loop body
LE: loop exit
PB: predicated region body
PF: predicated region fallthrough
CT: control target
= control target key end

     0   :  { %vm81_vm0 = vcmask 64512   ;;  %s241_s1 = inlined_call_operand.vmem [shape: bf16[128,8], index: 1, kind: input, shape index: {}]   ;;  %s242_s2 = inlined_call_operand.vmem [shape: f32[1,128], index: 2, kind: input, shape index: {}]   ;;  %s243_s0 = inlined_call_operand.vmem [shape: bf16[16,8], index: 0, kind: input, shape index: {}]   ;;  %s244_s3 = inlined_call_operand.vmem [shape: f32[16,128], index: 3, kind: output, shape index: {}]  }
   0x1   :  { %v174_v0 = vld [vmem:[%s241_s1 + $0x38] sm:$0xff]  ;;  %v173_v2 = vld [vmem:[%s241_s1 + $0x30] sm:$0xff]  ;;  %v172_v4 = vld [vmem:[%s241_s1 + $0x28] sm:$0xff] }
   0x2   :  { %v107_v1 = vsel %vm81_vm0, %v174_v0, 0  ;;  %v104_v3 = vsel %vm81_vm0, %v173_v2, 0  ;;  %v101_v5 = vsel %vm81_vm0, %v172_v4, 0  ;;  %v171_v6 = vld [vmem:[%s241_s1 + $0x20] sm:$0xff]  ;;  %v170_v8 = vld [vmem:[%s241_s1 + $0x18] sm:$0xff]  ;;  %v169_v10 = vld [vmem:[%s241_s1 + $0x10] sm:$0xff] }
   0x3   :  { %109 = vmatpush.bf16.xpose.msra.mxu0 %v107_v1  ;;  %v98_v7 = vsel %vm81_vm0, %v171_v6, 0  ;;  %v95_v9 = vsel %vm81_vm0, %v170_v8, 0  ;;  %v92_v11 = vsel %vm81_vm0, %v169_v10, 0  ;;  %v168_v12 = vld [vmem:[%s241_s1 + $0x8] sm:$0xff]  ;;  %v167_v14 = vld [vmem:[%s241_s1] sm:$0xff] }
   0x4   :  { %v89_v13 = vsel %vm81_vm0, %v168_v12, 0  ;;  %v86_v15 = vsel %vm81_vm0, %v167_v14, 0  ;;  %v166_v16 = vld [vmem:[%s243_s0] sm:$0xff] }
   0x5   :  { %v175_v17 = vld [vmem:[%s242_s2] ss:$0 sm:$0xff] }
   0xb   :  { %110 = vmatpush.bf16.xpose.msra.mxu0 %v104_v3 }
  0x13   :  { %111 = vmatpush.bf16.xpose.msra.mxu0 %v101_v5 }
  0x1b   :  { %112 = vmatpush.bf16.xpose.msra.mxu0 %v98_v7 }
  0x23   :  { %113 = vmatpush.bf16.xpose.msra.mxu0 %v95_v9 }
  0x2b   :  { %114 = vmatpush.bf16.xpose.msra.mxu0 %v92_v11 }
  0x33   :  { %115 = vmatpush.bf16.xpose.msra.mxu0 %v89_v13 }
  0x3b   :  { %116 = vmatpush.bf16.xpose.msra.mxu0 %v86_v15 }
  0x42   :  { %165 = vmatmul.msk.bf16.vlgmr.msra.gmra.mxu0 %vm81_vm0, %v166_v16 }
  0xbf   :  { %v118_v18 = vpop.f32.mrf.mxu0 }
  0xc0   :  { %v119_v19 = vadd.f32 %v175_v17, %v118_v18 }
  0xc2   :  { %123 = vst [vmem:[%s244_s3] sm:$0xff] %v119_v19 }
  0xc7   :  { %v120_v20 = vpop.f32.mrf.mxu0 }
  0xc8   :  { %v121_v21 = vadd.f32 %v175_v17, %v120_v20 }
  0xca   :  { %124 = vst [vmem:[%s244_s3 + $0x8] sm:$0xff] %v121_v21 }

// kernel: multi_head_self_attention.4
= control target key start
LH: loop header
LB: loop body
LE: loop exit
PB: predicated region body
PF: predicated region fallthrough
CT: control target
= control target key end

     0   :  { %s1465_s9 = smov 0   ;;  %s1467_s10 = smov 0   ;;  %s1685_s0 = inlined_call_operand.vmem [shape: f32[3,2,8,8], index: 0, kind: input, shape index: {}]   ;;  %s1686_s1 = inlined_call_operand.vmem [shape: f32[3,1,8], index: 1, kind: input, shape index: {}]   ;;  %s1687_s2 = inlined_call_operand.vmem [shape: bf16[2,8,8], index: 2, kind: output, shape index: {}]  }
   0x1   :  { %s1469_s11 = smov 0  }
   0x2 LB: > { %s1323_s12 = sadd.s32 4294967295, %s1444_s11   ;;  %s1482_s13 = sadd.s32 1, %s1444_s11   ;;  %s1444_s11 = sphi %s1469_s11, %s1690_s11   ;;  %s1440_s10 = sphi %s1467_s10, %s1689_s10   ;;  %s1436_s9 = sphi %s1465_s9, %s1688_s9  }
   0x3   : > { %s16_s14 = ssub.s32 %s1444_s11, %s1482_s13  ;;  %s19_s15 = sadd.s32 1, %s1440_s10 }
   0x4   : > { %p17_p0 = scmp.eq.s32.totalorder %s16_s14, 0  ;;  %p26_p1 = scmp.ne.s32.totalorder %s1440_s10, %s1436_s9 }
   0x5   : > { %p27_p2 = scmp.eq.s32.totalorder %s1444_s11, 0  ;;  %p1326_p4 = scmp.ge.s32.totalorder %s1444_s11, 2 }
   0x6   : > { %s1491_s16 = scalar_select %p17_p0, %s1440_s10, %s19_s15  }
   0x7   : > { %p28_p3 = por %p27_p2, %p26_p1  ;;  %102 = sbr.rel (%p1326_p4) target bundleno = 19 (0x13), region = 20 }
   0xc   : > { %105 = sbr.rel (!%p28_p3) target bundleno = 19 (0x13), region = 24  ;;  %s107_s17 = sand.u32 (%p28_p3), 1, %s1440_s10  }
   0xd   : > { %s1327_s18 = sshll.u32 (%p28_p3), %s1444_s11, 3  ;;  %s1336_s19 = smul.u32 (%p28_p3), 24, %s107_s17 }
   0xe   : > { %s111_s22 = scalar_lea.vmem (%p28_p3), %s1685_s0, %s1327_s18 }
   0xf   : > { %v144_v0 = vld [vmem:[%s111_s22] sm:$0xff] (%p28_p3)  ;;  %v146_v1 = vld [vmem:[%s111_s22 + $0x10] sm:$0xff] (%p28_p3)  ;;  %s109_s23 = scalar_lea.vmem (%p28_p3), [#allocation2], %s1336_s19 }
  0x10   : > { %v148_v2 = vld [vmem:[%s111_s22 + $0x20] sm:$0xff] (%p28_p3)  ;;  %145 = vst [vmem:[%s109_s23] sm:$0xff] (%p28_p3), %v144_v0 }
  0x11   : > { %147 = vst [vmem:[%s109_s23 + $0x8] sm:$0xff] %v146_v1 }
  0x12   : > { %149 = vst [vmem:[%s109_s23 + $0x10] sm:$0xff] %v148_v2 }
  0x13 PF: > { %p1328_p5 = scmp.ge.s32.totalorder %s1444_s11, 1  ;;  %p154_p6 = scmp.lt.s32.totalorder %s1444_s11, 3 }
  0x15   : > { %p155_p7 = pnand %p1328_p5, %p154_p6 }
  0x16   : > { %s161_s24 = sand.u32 (!%p155_p7), 1, %s1436_s9   ;;  %s1446_s29 = smov (!%p155_p7), 124  }
  0x17   : > { %158 = sbr.rel (%p155_p7) target bundleno = 1691 (0x69b), region = 62  ;;  %s1449_s6 = smov (!%p155_p7), 4  }
  0x18   : > { %s1337_s25 = smul.u32 (!%p155_p7), 24, %s161_s24  ;;  %p181_p8 = scmp.lt.s32.totalorder (!%p155_p7), %s1323_s12, 1 }
  0x1a   : > { %s1505_s28 = scalar_lea.vmem (!%p155_p7), [#allocation2], %s1337_s25 }
  0x1c   : > { %v1411_v3 = vld [vmem:[%s1686_s1 + $0x1] ss:$0 sm:$0xff]  ;;  %v1447_v6 = vmov 1983009808   ;;  %vm210_vm0 = vcmask 1047556   ;;  %vm711_vm1 = vcmask 1041408  }
  0x1d   : > { %v187_v4 = vld [vmem:[%s1505_s28 + $0x8] sm:$0xff]  ;;  %v213_v7 = vunpack.c.l.s4 %v1447_v6  ;;  %v1448_v12 = vmov 1934713408   ;;  %vm707_vm2 = vcmask 31744   ;;  %vm747_vm3 = vcmask 64512   ;;  %s1692_s12 = smov (!%p181_p8, %s1323_s12), 1 }
  0x1e   : > { %v200_v5 = vadd.f32 %v1411_v3, %v187_v4  ;;  %v235_v13 = vunpack.c.l.s4 %v1448_v12  ;;  %v186_v4 = vld [vmem:[%s1505_s28] sm:$0xff]  ;;  %s1329_s7 = sshll.u32 %s1692_s12, 2  ;;  %vm1262_vm12 = vcmask 60416  }
  0x1f   : > { %v1509_v8 = vunpack.c.0.s8 %v213_v7  ;;  %s184_s14 = scalar_lea.vmem %s1687_s2, %s1329_s7 }
  0x20   : > { %271 = vrot.lane.b32.xlu0 %v200_v5, %s1446_s29  ;;  %v274_v9 = vrot.slane %v200_v5, 4  ;;  %v1514_v17 = vunpack.c.0.s8 %v235_v13 }
  0x21   : > { %v279_v10 = vperm.slane %v200_v5, %v1509_v8  ;;  %v1412_v5 = vld [vmem:[%s1686_s1] ss:$0 sm:$0xff] }
  0x22   : > { %v275_v11 = vsel %vm210_vm0, 0.0, %v274_v9  ;;  %v195_v9 = vadd.f32 %v1412_v5, %v186_v4 }
  0x23   : > { %v283_v14 = vperm.slane %v275_v11, %v1509_v8  ;;  %v296_v15 = vrot.slane %v279_v10, 4 }
  0x24   : > { %v196_v13 = vmul.f32 0.5, %v195_v9 }
  0x25   : > { %v308_v23 = vrot.slane %v283_v14, 4 }
  0x92   : > { %v272_v16 = vpop.permute.xlu0 %271 }
  0x93   : > { %v284_v18 = vrot.slane %v272_v16, 4  ;;  %v289_v19 = vperm.slane %v272_v16, %v1509_v8 }
  0x95   : > { %v285_v20 = vsel %vm210_vm0, 0.0, %v284_v18  ;;  %v294_v21 = vrot.slane %v289_v19, 4  ;;  %v297_v22 = vsel %vm210_vm0, %v289_v19, %v296_v15 }
  0x96   : > { %v293_v24 = vperm.slane %v285_v20, %v1509_v8  ;;  %v305_v25 = vperm.slane %v297_v22, %v1514_v17 }
  0x97   : > { %v295_v26 = vsel %vm210_vm0, %v294_v21, %v279_v10 }
  0x98   : > { %v320_v27 = vrot.slane %v305_v25, 4  ;;  %v301_v28 = vperm.slane %v295_v26, %v1514_v17  ;;  %v306_v29 = vrot.slane %v293_v24, 4  ;;  %v309_v30 = vsel %vm210_vm0, %v293_v24, %v308_v23 }
  0x99   : > { %v317_v33 = vperm.slane %v309_v30, %v1514_v17  ;;  %v328_v34 = vpack.c.bf16 %v305_v25, %v305_v25 }
  0x9a   : > { %v321_v31 = vsel %vm210_vm0, 0.0, %v320_v27  ;;  %v318_v32 = vrot.slane %v301_v28, 4  ;;  %v326_v38 = vpack.c.bf16 %v301_v28, %v301_v28  ;;  %v307_v40 = vsel %vm210_vm0, %v306_v29, %v283_v14 }
  0x9b   : > { %v329_v35 = vpack.c.bf16 %v321_v31, %v321_v31  ;;  %v324_v37 = vrot.slane %v317_v33, 4  ;;  %v332_v42 = vpack.c.bf16 %v317_v33, %v317_v33  ;;  %v313_v44 = vperm.slane %v307_v40, %v1514_v17 }
  0x9c   : > { %v319_v36 = vsel %vm210_vm0, 0.0, %v318_v32  ;;  %v209_v29 = vrot.slane %v196_v13, 4 }
  0x9d   : > { %1371 = vxpose.binary.xlu1.c.b16.start.end [1/2] (short) (narrow) %v329_v35, %v328_v34, 16  ;;  %v327_v39 = vpack.c.bf16 %v319_v36, %v319_v36  ;;  %v325_v41 = vsel %vm210_vm0, 0.0, %v324_v37  ;;  %v322_v45 = vrot.slane %v313_v44, 4  ;;  %v330_v47 = vpack.c.bf16 %v313_v44, %v313_v44 }
  0x9e   : > { %v333_v43 = vpack.c.bf16 %v325_v41, %v325_v41  ;;  %v211_v31 = vsel %vm210_vm0, 0.0, %v209_v29  ;;  %v215_v35 = vperm.slane %v196_v13, %v1509_v8 }
  0x9f   : > { %1377 = vxpose.binary.xlu2.c.b16.start.end [1/2] (short) (narrow) %v327_v39, %v326_v38, 16  ;;  %v323_v46 = vsel %vm210_vm0, 0.0, %v322_v45  ;;  %v219_v33 = vperm.slane %v211_v31, %v1509_v8 }
  0xa0   : > { %1368 = vxpose.binary.xlu0.c.b16.start.end [1/2] (short) (narrow) %v333_v43, %v332_v42, 16  ;;  %v331_v48 = vpack.c.bf16 %v323_v46, %v323_v46  ;;  %v232_v38 = vrot.slane %v215_v35, 4 }
  0xa1   : > { %v244_v36 = vrot.slane %v219_v33, 4 }
  0xad   : > { %1374 = vxpose.binary.xlu1.c.b16.start.end [1/2] (short) (narrow) %v331_v48, %v330_v47, 16 }
 0x108   : > { %206 = vrot.lane.b32.xlu2 %v196_v13, %s1446_s29 }
 0x140   : > { %v1378_v55 = vpop.trf.xlu2 }
 0x148   : > { %v1379_v3 = vpop.trf.xlu2 }
 0x149   : > { %v1372_v49 = vpop.trf.xlu1 }
 0x14c   : > { %v1369_v50 = vpop.trf.xlu0 }
 0x14d   : > { %v575_v52 = vrot.slane %v1369_v50, 4 }
 0x14f   : > { %v576_v53 = vsel %vm210_vm0, %v575_v52, %v1372_v49 }
 0x150   : > { %v580_v56 = vperm.slane %v576_v53, %v1509_v8 }
 0x151   : > { %v1373_v51 = vpop.trf.xlu1 }
 0x152   : > { %v581_v61 = vrot.slane %v580_v56, 4 }
 0x154   : > { %v1370_v54 = vpop.trf.xlu0 }
 0x155   : > { %v595_v58 = vrot.slane %v1370_v54, 4 }
 0x157   : > { %v596_v63 = vsel %vm210_vm0, %v595_v58, %v1373_v51 }
 0x158   : > { %v600_v1 = vperm.slane %v596_v63, %v1509_v8 }
 0x159   : > { %v1375_v57 = vpop.trf.xlu1 }
 0x15a   : > { %v569_v59 = vrot.slane %v1375_v57, 4  ;;  %v601_v11 = vrot.slane %v600_v1, 4 }
 0x15c   : > { %v570_v60 = vsel %vm210_vm0, %v569_v59, %v1378_v55 }
 0x15d   : > { %v574_v62 = vperm.slane %v570_v60, %v1509_v8 }
 0x15f   : > { %v582_v0 = vsel %vm210_vm0, %v581_v61, %v574_v62 }
 0x160   : > { %v586_v6 = vperm.slane %v582_v0, %v1514_v17 }
 0x161   : > { %v1376_v2 = vpop.trf.xlu1 }
 0x162   : > { %v589_v7 = vrot.slane %v1376_v2, 4  ;;  %v587_v14 = vrot.slane %v586_v6, 4  ;;  %v613_v26 = vshrl.u32 %v586_v6, 16  ;;  %v207_v30 = vpop.permute.xlu2 %206 }
 0x163   : > { %v220_v32 = vrot.slane %v207_v30, 4  ;;  %v225_v39 = vperm.slane %v207_v30, %v1509_v8 }
 0x164   : > { %v590_v10 = vsel %vm210_vm0, %v589_v7, %v1379_v3  ;;  %v588_v18 = vsel %vm210_vm0, 0, %v587_v14 }
 0x165   : > { %v594_v12 = vperm.slane %v590_v10, %v1509_v8  ;;  %v621_v21 = vshrl.u32 %v588_v18, 16  ;;  %v221_v34 = vsel %vm210_vm0, 0.0, %v220_v32  ;;  %v230_v43 = vrot.slane %v225_v39, 4 }
 0x166   : > { %v229_v37 = vperm.slane %v221_v34, %v1509_v8  ;;  %v233_v44 = vsel %vm210_vm0, %v225_v39, %v232_v38 }
 0x167   : > { %v602_v15 = vsel %vm210_vm0, %v601_v11, %v594_v12  ;;  %v241_v46 = vperm.slane %v233_v44, %v1514_v17  ;;  %v231_v49 = vsel %vm210_vm0, %v230_v43, %v215_v35  ;;  %v1413_v43 = vld [vmem:[%s1686_s1 + $0x2] ss:$0 sm:$0xff] }
 0x168   : > { %v606_v16 = vperm.slane %v602_v15, %v1514_v17  ;;  %v242_v40 = vrot.slane %v229_v37, 4  ;;  %v245_v41 = vsel %vm210_vm0, %v229_v37, %v244_v36  ;;  %v237_v51 = vperm.slane %v231_v49, %v1514_v17 }
 0x169   : > { %v253_v42 = vperm.slane %v245_v41, %v1514_v17  ;;  %v256_v52 = vrot.slane %v241_v46, 4  ;;  %v264_v60 = vpack.c.bf16 %v241_v46, %v241_v46 }
 0x16a   : > { %v607_v19 = vrot.slane %v606_v16, 4  ;;  %v614_v25 = vshrl.u32 %v606_v16, 16  ;;  %v611_v27 = vpack.i.b16 %v606_v16, %v586_v6  ;;  %v243_v45 = vsel %vm210_vm0, %v242_v40, %v219_v33 }
 0x16b   : > { %v249_v47 = vperm.slane %v243_v45, %v1514_v17  ;;  %v260_v48 = vrot.slane %v253_v42, 4  ;;  %v268_v55 = vpack.c.bf16 %v253_v42, %v253_v42  ;;  %v254_v57 = vrot.slane %v237_v51, 4  ;;  %v188_v42 = vld [vmem:[%s1505_s28 + $0x10] sm:$0xff] }
 0x16c   : > { %v608_v20 = vsel %vm210_vm0, 0, %v607_v19  ;;  %v615_v28 = vpack.i.b16 %v614_v25, %v613_v26  ;;  %v257_v58 = vsel %vm210_vm0, 0.0, %v256_v52  ;;  %v262_v4 = vpack.c.bf16 %v237_v51, %v237_v51 }
 0x16d   : > { %v622_v22 = vshrl.u32 %v608_v20, 16  ;;  %v619_v23 = vpack.i.b16 %v608_v20, %v588_v18  ;;  %v258_v53 = vrot.slane %v249_v47, 4  ;;  %v261_v54 = vsel %vm210_vm0, 0.0, %v260_v48 }
 0x16e   : > { %v269_v56 = vpack.c.bf16 %v261_v54, %v261_v54  ;;  %v266_v61 = vpack.c.bf16 %v249_v47, %v249_v47  ;;  %v265_v62 = vpack.c.bf16 %v257_v58, %v257_v58  ;;  %v405_v0 = vrot.slane %v268_v55, 4 }
 0x16f   : > { %v623_v24 = vpack.i.b16 %v622_v22, %v621_v21  ;;  %v259_v59 = vsel %vm210_vm0, 0.0, %v258_v53  ;;  %v255_v3 = vsel %vm210_vm0, 0.0, %v254_v57  ;;  %v204_v44 = vadd.f32 %v1413_v43, %v188_v42 }
 0x170   : > { %v267_v63 = vpack.c.bf16 %v259_v59, %v259_v59  ;;  %v423_v1 = vrot.slane %v269_v56, 4  ;;  %v398_v5 = vrot.slane %v266_v61, 4  ;;  %v263_v6 = vpack.c.bf16 %v255_v3, %v255_v3 }
 0x171   : > { %1380 = vxpose.binary.xlu1.c.b16.start.end [1/2] (short) (narrow) %v623_v24, %v619_v23, 16  ;;  %v406_v7 = vsel %vm210_vm0, %v405_v0, %v264_v60  ;;  %v338_v51 = vrot.slane %v204_v44, 4 }
 0x172   : > { %v417_v9 = vrot.slane %v267_v63, 4  ;;  %v424_v10 = vsel %vm210_vm0, %v423_v1, %v265_v62  ;;  %v400_v11 = vsel %vm210_vm0, %v398_v5, %v262_v4  ;;  %v410_v12 = vperm.slane %v406_v7, %v1509_v8  ;;  %335 = vrot.lane.b32.xlu2 %v204_v44, %s1446_s29 }
 0x173   : > { %v428_v13 = vperm.slane %v424_v10, %v1509_v8  ;;  %v404_v16 = vperm.slane %v400_v11, %v1509_v8  ;;  %v339_v52 = vsel %vm210_vm0, 0.0, %v338_v51  ;;  %v343_v62 = vperm.slane %v204_v44, %v1509_v8 }
 0x174   : > { %v418_v15 = vsel %vm210_vm0, %v417_v9, %v263_v6  ;;  %v411_v19 = vrot.slane %v410_v12, 4  ;;  %v347_v53 = vperm.slane %v339_v52, %v1509_v8 }
 0x175   : > { %v422_v20 = vperm.slane %v418_v15, %v1509_v8  ;;  %v429_v21 = vrot.slane %v428_v13, 4 }
 0x176   : > { %v412_v24 = vsel %vm210_vm0, %v411_v19, %v404_v16  ;;  %v372_v56 = vrot.slane %v347_v53, 4 }
 0x177   : > { %v430_v25 = vsel %vm210_vm0, %v429_v21, %v422_v20  ;;  %v416_v30 = vperm.slane %v412_v24, %v1514_v17 }
 0x178   : > { %v434_v31 = vperm.slane %v430_v25, %v1514_v17 }
 0x179   : > { %v438_v37 = vshrl.u32 %v416_v30, 16 }
 0x17a   : > { %v439_v38 = vshrl.u32 %v434_v31, 16  ;;  %v437_v40 = vpack.i.b16 %v434_v31, %v416_v30 }
 0x17c   : > { %v440_v41 = vpack.i.b16 %v439_v38, %v438_v37 }
 0x181   : > { %1383 = vxpose.binary.xlu1.c.b16.start.end [1/2] (short) (narrow) %v615_v28, %v611_v27, 16 }
 0x1cc   : > { %v336_v54 = vpop.permute.xlu2 %335 }
 0x1cd   : > { %v348_v55 = vrot.slane %v336_v54, 4  ;;  %v353_v59 = vperm.slane %v336_v54, %v1509_v8 }
 0x1cf   : > { %v349_v57 = vsel %vm210_vm0, 0.0, %v348_v55  ;;  %v358_v63 = vrot.slane %v353_v59, 4 }
 0x1d0   : > { %v357_v58 = vperm.slane %v349_v57, %v1509_v8 }
 0x1d1   : > { %v359_v4 = vsel %vm210_vm0, %v358_v63, %v343_v62 }
 0x1d2   : > { %v373_v60 = vsel %vm210_vm0, %v357_v58, %v372_v56  ;;  %v365_v5 = vperm.slane %v359_v4, %v1514_v17 }
 0x1d3   : > { %v381_v61 = vperm.slane %v373_v60, %v1514_v17 }
 0x1d4   : > { %v382_v12 = vrot.slane %v365_v5, 4  ;;  %v390_v15 = vpack.c.bf16 %v365_v5, %v365_v5 }
 0x1d5   : > { %v388_v0 = vrot.slane %v381_v61, 4  ;;  %v396_v1 = vpack.c.bf16 %v381_v61, %v381_v61 }
 0x21d   : > { %v1381_v50 = vpop.trf.xlu1 }
 0x21e   : > { %v689_v18 = vrot.slane %v1381_v50, 4 }
 0x225   : > { %v1382_v2 = vpop.trf.xlu1 }
 0x226   : > { %v695_v23 = vrot.slane %v1382_v2, 4  ;;  %v389_v2 = vsel %vm210_vm0, 0.0, %v388_v0 }
 0x227   : > { %v397_v3 = vpack.c.bf16 %v389_v2, %v389_v2 }
 0x22d   : > { %v1384_v14 = vpop.trf.xlu1 }
 0x22e   : > { %v690_v22 = vsel %vm210_vm0, %v689_v18, %v1384_v14  ;;  %v383_v14 = vsel %vm210_vm0, 0.0, %v382_v12 }
 0x22f   : > { %v694_v26 = vperm.slane %v690_v22, %v1514_v17  ;;  %v391_v16 = vpack.c.bf16 %v383_v14, %v383_v14  ;;  %v370_v22 = vrot.slane %v357_v58, 4 }
 0x231   : > { %v704_v33 = vshrl.u32 %v694_v26, 16 }
 0x235   : > { %v1385_v27 = vpop.trf.xlu1 }
 0x236   : > { %v696_v28 = vsel %vm210_vm0, %v695_v23, %v1385_v27  ;;  %v371_v23 = vsel %vm210_vm0, %v370_v22, %v347_v53 }
 0x237   : > { %v700_v29 = vperm.slane %v696_v28, %v1514_v17  ;;  %v377_v24 = vperm.slane %v371_v23, %v1514_v17 }
 0x239   : > { %v703_v32 = vpack.i.b16 %v700_v29, %v694_v26  ;;  %v705_v34 = vshrl.u32 %v700_v29, 16  ;;  %v386_v25 = vrot.slane %v377_v24, 4  ;;  %v394_v27 = vpack.c.bf16 %v377_v24, %v377_v24 }
 0x23a   : > { %v360_v29 = vrot.slane %v343_v62, 4 }
 0x23b   : > { %v713_v35 = vsel %vm711_vm1, %v703_v32, 0  ;;  %v706_v36 = vpack.i.b16 %v705_v34, %v704_v33  ;;  %v387_v26 = vsel %vm210_vm0, 0.0, %v386_v25 }
 0x23c   : > { %722 = vmatpush.bf16.msra.mxu0 %v713_v35  ;;  %v395_v28 = vpack.c.bf16 %v387_v26, %v387_v26  ;;  %v361_v30 = vsel %vm210_vm0, %v353_v59, %v360_v29 }
 0x23d   : > { %v732_v39 = vsel %vm711_vm1, %v706_v36, 0  ;;  %v369_v31 = vperm.slane %v361_v30, %v1514_v17 }
 0x23e   : > { %741 = vmatpush.bf16.msra.mxu1 %v732_v39 }
 0x23f   : > { %1330 = vmatmul.msk.bf16.vlgmr.msra.gmra.mxu0 %vm707_vm2, %v437_v40  ;;  %v384_v32 = vrot.slane %v369_v31, 4  ;;  %v392_v34 = vpack.c.bf16 %v369_v31, %v369_v31 }
 0x241   : > { %1331 = vmatmul.msk.bf16.vlgmr.msra.gmra.mxu1 %vm707_vm2, %v440_v41  ;;  %v385_v33 = vsel %vm210_vm0, 0.0, %v384_v32 }
 0x242   : > { %v393_v35 = vpack.c.bf16 %v385_v33, %v385_v33 }
 0x2bc   : > { %v724_v45 = vpop.f32.mrf.mxu0 }
 0x2bd   : > { %v748_v46 = vsel %vm747_vm3, %v724_v45, -inf }
 0x2be   : > { %v743_v47 = vpop.f32.mrf.mxu1  ;;  %749 = vmax.xlane.f32.xlu0 %v748_v46 }
 0x2bf   : > { %v751_v48 = vsel %vm747_vm3, %v743_v47, -inf }
 0x2c0   : > { %752 = vmax.xlane.f32.xlu1 %v751_v48 }
 0x2c4   : > { %v726_v49 = vpop.f32.mrf.mxu0 }
 0x2c6   : > { %v745_v50 = vpop.f32.mrf.mxu1 }
 0x2e7   : > { %1386 = vxpose.binary.xlu0.c.b16.start.end [1/2] (short) (narrow) %v397_v3, %v396_v1, 16 }
 0x2f7   : > { %1395 = vxpose.binary.xlu0.c.b16.start.end [1/2] (short) (narrow) %v391_v16, %v390_v15, 16 }
 0x331   : > { %v750_v6 = vpop.xlane.xlu0 %749 }
 0x332   : > { %v754_v7 = vsub.f32 %v724_v45, %v750_v6 }
 0x333   : > { %v753_v9 = vpop.xlane.xlu1 %752 }
 0x334   : > { %v756_v10 = vmul.f32 1.442695, %v754_v7  ;;  %v755_v11 = vsub.f32 %v743_v47, %v753_v9 }
 0x336   : > { %1414 = vpow2.f32 %v756_v10  ;;  %v758_v13 = vmul.f32 1.442695, %v755_v11 }
 0x338   : > { %1416 = vpow2.f32 %v758_v13 }
 0x33c   : > { %v1415_v18 = vpop.eup %1414 }
 0x33d   : > { %v760_v19 = vsel %vm747_vm3, %v1415_v18, 0.0 }
 0x33e   : > { %v1417_v20 = vpop.eup %1416  ;;  %761 = vadd.xlane.f32.xlu2 %v760_v19 }
 0x33f   : > { %v763_v21 = vsel %vm747_vm3, %v1417_v20, 0.0 }
 0x340   : > { %764 = vadd.xlane.f32.xlu1 %v763_v21 }
 0x367   : > { %1392 = vxpose.binary.xlu2.c.b16.start.end [1/2] (short) (narrow) %v395_v28, %v394_v27, 16 }
 0x37a   : > { %1389 = vxpose.binary.xlu1.c.b16.start.end [1/2] (short) (narrow) %v393_v35, %v392_v34, 16 }
 0x393   : > { %v1387_v0 = vpop.trf.xlu0 }
 0x394   : > { %v932_v5 = vrot.slane %v1387_v0, 4 }
 0x39b   : > { %v1388_v1 = vpop.trf.xlu0 }
 0x3a3   : > { %v1396_v3 = vpop.trf.xlu0 }
 0x3ab   : > { %v1397_v15 = vpop.trf.xlu0 }
 0x3b1   : > { %v762_v36 = vpop.xlane.xlu2 %761 }
 0x3b2   : > { %1418 = vrcp.f32 %v762_v36  ;;  %v777_v43 = vand.u32 2147483648, %v762_v36  ;;  %v775_v46 = vand.u32 2147483647, %v762_v36  ;;  %vm771_vm5 = vweird.f32 %v762_v36 }
 0x3b3   : > { %v765_v37 = vpop.xlane.xlu1 %764 }
 0x3b4   : > { %1420 = vrcp.f32 %v765_v37  ;;  %v792_v47 = vand.u32 2147483648, %v765_v37  ;;  %v790_v50 = vand.u32 2147483647, %v765_v37  ;;  %v778_v51 = vor.u32 1.1754944e-38, %v777_v43 }
 0x3b5   : > { %vm786_vm8 = vweird.f32 %v765_v37  ;;  %vm776_vm9 = vcmp.eq.f32.partialorder %v775_v46, 8.507059e+37 }
 0x3b6   : > { %v793_v55 = vor.u32 1.1754944e-38, %v792_v47  ;;  %vm791_vm11 = vcmp.eq.f32.partialorder %v790_v50, 8.507059e+37 }
 0x3b8   : > { %v1419_v38 = vpop.eup %1418 }
 0x3b9   : > { %v767_v39 = vmul.f32 %v1419_v38, %v762_v36  ;;  %vm772_vm4 = vweird.f32 %v1419_v38 }
 0x3ba   : > { %v1421_v40 = vpop.eup %1420  ;;  %vm773_vm7 = vmor %vm771_vm5, %vm772_vm4 }
 0x3bb   : > { %v768_v41 = vsub.f32 1.0, %v767_v39  ;;  %v782_v42 = vmul.f32 %v1421_v40, %v765_v37  ;;  %vm787_vm6 = vweird.f32 %v1421_v40 }
 0x3bc   : > { %vm788_vm10 = vmor %vm786_vm8, %vm787_vm6 }
 0x3bd   : > { %v769_v44 = vmul.f32 %v1419_v38, %v768_v41  ;;  %v783_v45 = vsub.f32 1.0, %v782_v42 }
 0x3bf   : > { %v784_v48 = vmul.f32 %v1421_v40, %v783_v45  ;;  %v770_v49 = vadd.f32 %v1419_v38, %v769_v44 }
 0x3c1   : > { %v774_v52 = vsel %vm773_vm7, %v1419_v38, %v770_v49  ;;  %v785_v53 = vadd.f32 %v1421_v40, %v784_v48 }
 0x3c2   : > { %v779_v54 = vsel %vm776_vm9, %v778_v51, %v774_v52 }
 0x3c3   : > { %v780_v56 = vmul.f32 %v1415_v18, %v779_v54  ;;  %v789_v57 = vsel %vm788_vm10, %v1421_v40, %v785_v53  ;;  %v952_v18 = vrot.slane %v1388_v1, 4 }
 0x3c4   : > { %v794_v58 = vsel %vm791_vm11, %v793_v55, %v789_v57 }
 0x3c5   : > { %v796_v59 = vpack.c.bf16 %v780_v56, %v780_v56  ;;  %v795_v60 = vmul.f32 %v1417_v20, %v794_v58 }
 0x3c7   : > { %v1068_v61 = vsel %vm747_vm3, %v796_v59, 0  ;;  %v797_v62 = vpack.c.bf16 %v795_v60, %v795_v60 }
 0x3c8   : > { %1077 = vmatpush.bf16.xpose.msra.mxu2 %v1068_v61 }
 0x3c9   : > { %v1087_v63 = vsel %vm747_vm3, %v797_v62, 0 }
 0x3ca   : > { %1096 = vmatpush.bf16.xpose.msra.mxu3 %v1087_v63 }
 0x408   : > { %v1393_v2 = vpop.trf.xlu2 }
 0x409   : > { %v926_v4 = vrot.slane %v1393_v2, 4 }
 0x40b   : > { %v927_v6 = vsel %vm210_vm0, %v926_v4, %v1396_v3 }
 0x40c   : > { %v931_v12 = vperm.slane %v927_v6, %v1509_v8 }
 0x410   : > { %v1394_v9 = vpop.trf.xlu2 }
 0x411   : > { %v946_v13 = vrot.slane %v1394_v9, 4 }
 0x413   : > { %v947_v19 = vsel %vm210_vm0, %v946_v13, %v1397_v15 }
 0x414   : > { %v951_v24 = vperm.slane %v947_v19, %v1509_v8 }
 0x426   : > { %v1390_v7 = vpop.trf.xlu1 }
 0x427   : > { %v933_v10 = vsel %vm210_vm0, %v932_v5, %v1390_v7 }
 0x428   : > { %v937_v11 = vperm.slane %v933_v10, %v1509_v8 }
 0x42a   : > { %v938_v14 = vrot.slane %v937_v11, 4 }
 0x42c   : > { %v939_v16 = vsel %vm210_vm0, %v938_v14, %v931_v12 }
 0x42d   : > { %v943_v21 = vperm.slane %v939_v16, %v1514_v17 }
 0x42e   : > { %v1391_v20 = vpop.trf.xlu1 }
 0x42f   : > { %v953_v22 = vsel %vm210_vm0, %v952_v18, %v1391_v20  ;;  %v944_v26 = vrot.slane %v943_v21, 4  ;;  %v970_v29 = vshrl.u32 %v943_v21, 16 }
 0x430   : > { %v957_v23 = vperm.slane %v953_v22, %v1509_v8 }
 0x431   : > { %v945_v31 = vsel %vm210_vm0, 0, %v944_v26 }
 0x432   : > { %v958_v25 = vrot.slane %v957_v23, 4  ;;  %v978_v36 = vshrl.u32 %v945_v31, 16 }
 0x434   : > { %v959_v27 = vsel %vm210_vm0, %v958_v25, %v951_v24 }
 0x435   : > { %v963_v28 = vperm.slane %v959_v27, %v1514_v17 }
 0x437   : > { %v971_v30 = vshrl.u32 %v963_v28, 16  ;;  %v964_v32 = vrot.slane %v963_v28, 4  ;;  %v968_v33 = vpack.i.b16 %v963_v28, %v943_v21 }
 0x439   : > { %v972_v34 = vpack.i.b16 %v971_v30, %v970_v29  ;;  %v965_v35 = vsel %vm210_vm0, 0, %v964_v32 }
 0x43a   : > { %v979_v37 = vshrl.u32 %v965_v35, 16  ;;  %v976_v38 = vpack.i.b16 %v965_v35, %v945_v31 }
 0x43b   : > { %1401 = vxpose.binary.xlu0.c.b16.start.end [1/2] (short) (narrow) %v972_v34, %v968_v33, 16 }
 0x43c   : > { %v980_v39 = vpack.i.b16 %v979_v37, %v978_v36 }
 0x43e   : > { %1398 = vxpose.binary.xlu2.c.b16.start.end [1/2] (short) (narrow) %v980_v39, %v976_v38, 16 }
 0x4df   : > { %v1399_v40 = vpop.trf.xlu2 }
 0x4e0   : > { %v1046_v42 = vrot.slane %v1399_v40, 4 }
 0x4e7   : > { %v1402_v41 = vpop.trf.xlu0  ;;  %v1400_v43 = vpop.trf.xlu2 }
 0x4e8   : > { %v1047_v44 = vsel %vm210_vm0, %v1046_v42, %v1402_v41  ;;  %v1052_v45 = vrot.slane %v1400_v43, 4 }
 0x4e9   : > { %v1051_v46 = vperm.slane %v1047_v44, %v1514_v17 }
 0x4eb   : > { %v1061_v50 = vshrl.u32 %v1051_v46, 16 }
 0x4ef   : > { %v1403_v47 = vpop.trf.xlu0 }
 0x4f0   : > { %v1053_v48 = vsel %vm210_vm0, %v1052_v45, %v1403_v47 }
 0x4f1   : > { %v1057_v49 = vperm.slane %v1053_v48, %v1514_v17 }
 0x4f3   : > { %v1062_v51 = vshrl.u32 %v1057_v49, 16  ;;  %v1060_v52 = vpack.i.b16 %v1057_v49, %v1051_v46 }
 0x4f5   : > { %1332 = vmatmul.msk.bf16.vlgmr.msra.gmra.mxu2 %vm747_vm3, %v1060_v52  ;;  %v1063_v53 = vpack.i.b16 %v1062_v51, %v1061_v50 }
 0x4f7   : > { %1333 = vmatmul.msk.bf16.vlgmr.msra.gmra.mxu3 %vm747_vm3, %v1063_v53 }
 0x578   : > { %v1079_v54 = vpop.f32.mrf.mxu2 }
 0x57a   : > { %v1098_v55 = vpop.f32.mrf.mxu3 }
 0x57b   : > { %v1404_v56 = vpack.i.bf16 %v1098_v55, %v1079_v54 }
 0x57d   : > { %1405 = vxpose.xlu1.b32.start.end [1/1] (short) (narrow) %v1404_v56, 8 }
 0x580   : > { %v1081_v57 = vpop.f32.mrf.mxu2 }
 0x582   : > { %v1100_v58 = vpop.f32.mrf.mxu3 }
 0x621   : > { %v1406_v59 = vpop.trf.xlu1 }
 0x622   : > { %v1410_v60 = vunpack.i.h.bf16 %v1406_v59  ;;  %v1407_v61 = vunpack.i.l.bf16 %v1406_v59 }
 0x624   : > { %v1176_v62 = vrot.slane %v1410_v60, 4  ;;  %v1181_v63 = vperm.slane %v1410_v60, %v1509_v8  ;;  %v1166_v0 = vrot.slane %v1407_v61, 4  ;;  %v1171_v1 = vperm.slane %v1407_v61, %v1509_v8 }
 0x626   : > { %v1177_v2 = vsel %vm210_vm0, 0.0, %v1176_v62  ;;  %v1186_v3 = vrot.slane %v1181_v63, 4  ;;  %v1167_v4 = vsel %vm210_vm0, 0.0, %v1166_v0  ;;  %v1188_v5 = vrot.slane %v1171_v1, 4 }
 0x627   : > { %v1185_v6 = vperm.slane %v1177_v2, %v1509_v8  ;;  %v1175_v7 = vperm.slane %v1167_v4, %v1509_v8 }
 0x628   : > { %v1187_v9 = vsel %vm210_vm0, %v1186_v3, %v1171_v1  ;;  %v1189_v10 = vsel %vm210_vm0, %v1181_v63, %v1188_v5 }
 0x629   : > { %v1198_v11 = vrot.slane %v1185_v6, 4  ;;  %v1193_v12 = vperm.slane %v1187_v9, %v1514_v17  ;;  %v1197_v13 = vperm.slane %v1189_v10, %v1514_v17  ;;  %v1200_v14 = vrot.slane %v1175_v7, 4 }
 0x62b   : > { %v1199_v15 = vsel %vm210_vm0, %v1198_v11, %v1175_v7  ;;  %v1201_v16 = vsel %vm210_vm0, %v1185_v6, %v1200_v14  ;;  %v1210_v18 = vrot.slane %v1193_v12, 4  ;;  %v1212_v19 = vrot.slane %v1197_v13, 4 }
 0x62c   : > { %v1205_v20 = vperm.slane %v1199_v15, %v1514_v17  ;;  %v1209_v21 = vperm.slane %v1201_v16, %v1514_v17 }
 0x62d   : > { %v1213_v22 = vsel %vm210_vm0, 0.0, %v1212_v19  ;;  %v1211_v26 = vsel %vm210_vm0, 0.0, %v1210_v18  ;;  %v1218_v28 = vsel %vm210_vm0, %v1212_v19, %v1193_v12 }
 0x62e   : > { %v1214_v23 = vrot.slane %v1205_v20, 4  ;;  %v1216_v24 = vrot.slane %v1209_v21, 4  ;;  %v1223_v25 = vrot.slane %v1213_v22, 4  ;;  %v1222_v33 = vperm.slane %v1218_v28, %v1509_v8 }
 0x630   : > { %v1217_v27 = vsel %vm210_vm0, 0.0, %v1216_v24  ;;  %v1224_v29 = vsel %vm210_vm0, %v1223_v25, %v1211_v26  ;;  %v1215_v32 = vsel %vm210_vm0, 0.0, %v1214_v23  ;;  %v1229_v34 = vsel %vm210_vm0, %v1216_v24, %v1205_v20 }
 0x631   : > { %v1234_v30 = vrot.slane %v1217_v27, 4  ;;  %v1228_v31 = vperm.slane %v1224_v29, %v1509_v8  ;;  %v1233_v39 = vperm.slane %v1229_v34, %v1509_v8 }
 0x633   : > { %v1235_v35 = vsel %vm210_vm0, %v1234_v30, %v1215_v32  ;;  %v1240_v36 = vrot.slane %v1228_v31, 4 }
 0x634   : > { %v1239_v37 = vperm.slane %v1235_v35, %v1509_v8 }
 0x635   : > { %v1241_v38 = vsel %vm210_vm0, %v1240_v36, %v1222_v33 }
 0x636   : > { %v1245_v40 = vperm.slane %v1241_v38, %v1514_v17  ;;  %v1246_v41 = vrot.slane %v1239_v37, 4 }
 0x638   : > { %v1247_v42 = vsel %vm210_vm0, %v1246_v41, %v1233_v39  ;;  %v1254_v43 = vrot.slane %v1245_v40, 4 }
 0x639   : > { %v1251_v44 = vperm.slane %v1247_v42, %v1514_v17 }
 0x63b   : > { %v1255_v45 = vsel %vm210_vm0, %v1251_v44, %v1254_v43  ;;  %v1252_v46 = vrot.slane %v1251_v44, 4 }
 0x63c   : > { %1257 = vrot.lane.b32.xlu2 %v1255_v45, %s1449_s6 }
 0x63d   : > { %v1253_v47 = vsel %vm210_vm0, %v1252_v46, %v1245_v40 }
 0x696   : > { %v1258_v8 = vpop.permute.xlu2 %1257 }
 0x697   : > { %v1260_v17 = vsel %vm707_vm2, %v1253_v47, %v1258_v8 }
 0x698   : > { %v1261_v48 = vpack.c.bf16 %v1260_v17, %v1260_v17 }
 0x69a   : > { %1263 = vst.msk [vmem:[%s184_s14] sm:$0xf] %vm1262_vm12, %v1261_v48 }
 0x69b PF: > { %p9_p9 = scmp.ge.s32.totalorder %s1482_s13, 4   ;;  %s1688_s9 = smov %s1440_s10 }
 0x69c   : > { %s1689_s10 = smov %s1491_s16  ;;  %s1690_s11 = smov %s1482_s13 }
 0x69d   :  { %11 = sbr.rel (!%p9_p9) target bundleno = 2 (0x2), region = 101 }

</bundles_post_ra>
